<compile_context>
chip_gen: v6e
topology: v6e:2x2x1
jax: 0.10.0
libtpu: 0.0.40
codegen_flags: <defaults>
</compile_context>

<pallas_src>
import jax
import jax.numpy as jnp
from jax.experimental import pallas as pl
from jax.experimental.pallas import tpu as pltpu


def _round_up(x, m):
    return ((x + m - 1) // m) * m


def _fused_mlp_kernel(x_ref, w_ref, b_ref, o_ref, act_ref):
    """One grid step = one layer of the MLP applied to one batch tile.

    x_ref  : (tb, Dpad)      padded input activations (f32)
    w_ref  : (1, Dpad, Dpad) this layer's padded weight tile (bf16)
    b_ref  : (1, 1, Dpad)    this layer's padded bias (f32)
    o_ref  : (tb, Dpad)      padded output slab (written only on the last layer)
    act_ref: (tb, Dpad)      f32 VMEM scratch holding the running activation
    """
    layer = pl.program_id(1)
    n_layers = pl.num_programs(1)

    # Load the (padded) input into the resident activation buffer at layer 0.
    @pl.when(layer == 0)
    def _():
        act_ref[...] = x_ref[...].astype(jnp.float32)

    # MXU matmul in bf16 with f32 accumulation; bias add / ReLU stay in f32.
    w = w_ref[0]                               # (Dpad, Dpad) bf16
    a = act_ref[...].astype(w.dtype)           # (tb, Dpad)   bf16
    y = jnp.dot(a, w, preferred_element_type=jnp.float32)
    y = y + b_ref[0]                           # (1, Dpad) broadcasts over batch

    # ReLU after every layer except the last; activation stays resident in VMEM.
    @pl.when(layer < n_layers - 1)
    def _():
        act_ref[...] = jnp.maximum(y, 0.0)

    # Only the final layer writes to HBM (lane-dense, 128-padded slab).
    @pl.when(layer == n_layers - 1)
    def _():
        o_ref[...] = y.astype(o_ref.dtype)


def fc_forward(params, x, *, compute_dtype=jnp.bfloat16, batch_tile=256):
    """Forward pass of `fc`. params: list of (w [in,out], b [out]); x: [B, input_size]."""
    B, Din = x.shape
    L = len(params)
    dims = [Din] + [w.shape[1] for (w, _) in params]
    Dpad = _round_up(max(dims), 128)

    # Batch tiling: small batches -> a single sublane-aligned tile.
    if B <= batch_tile:
        tb = _round_up(B, 8)
    else:
        tb = batch_tile
    Bpad = _round_up(B, tb)
    nb = Bpad // tb

    # Zero-pad and stack weights/biases so every layer is a uniform (Dpad, Dpad) tile.
    w_stack = jnp.zeros((L, Dpad, Dpad), compute_dtype)
    b_stack = jnp.zeros((L, 1, Dpad), jnp.float32)
    for i, (w, b) in enumerate(params):
        fi, fo = w.shape
        w_stack = w_stack.at[i, :fi, :fo].set(w.astype(compute_dtype))
        b_stack = b_stack.at[i, 0, :fo].set(b.astype(jnp.float32))

    x_pad = jnp.zeros((Bpad, Dpad), x.dtype).at[:B, :Din].set(x)

    out_pad = pl.pallas_call(
        _fused_mlp_kernel,
        out_shape=jax.ShapeDtypeStruct((Bpad, Dpad), x.dtype),
        grid_spec=pltpu.PrefetchScalarGridSpec(
            num_scalar_prefetch=0,
            grid=(nb, L),
            in_specs=[
                # Input block index does not depend on the layer axis -> fetched
                # once per batch block, resident across the layer loop.
                pl.BlockSpec((tb, Dpad), lambda b, l: (b, 0)),
                # Per-layer weight tile: auto double-buffered across the layer
                # axis, i.e. layer l+1's weights are DMA'd while layer l computes.
                pl.BlockSpec((1, Dpad, Dpad), lambda b, l: (l, 0, 0)),
                pl.BlockSpec((1, 1, Dpad), lambda b, l: (l, 0, 0)),
            ],
            out_specs=pl.BlockSpec((tb, Dpad), lambda b, l: (b, 0)),
            scratch_shapes=[pltpu.VMEM((tb, Dpad), jnp.float32)],
        ),
        compiler_params=pltpu.CompilerParams(
            dimension_semantics=("parallel", "arbitrary")),
    )(x_pad, w_stack, b_stack)

    Dout = params[-1][0].shape[1]
    return out_pad[:B, :Dout]


def init_fc_params(key, input_size, output_size, hidden_size, n_hidden_layers):
    """Deterministic init mimicking nn.Linear default (uniform +/- 1/sqrt(fan_in)).
    Weights are stored [in, out] (transpose of nn.Linear's [out, in])."""
    sizes = [(input_size, hidden_size)]
    sizes += [(hidden_size, hidden_size)] * n_hidden_layers
    sizes += [(hidden_size, output_size)]
    params = []
    for (fan_in, fan_out) in sizes:
        key, kw, kb = jax.random.split(key, 3)
        bound = 1.0 / jnp.sqrt(jnp.float32(fan_in))
        w = jax.random.uniform(kw, (fan_in, fan_out), jnp.float32, -bound, bound)
        b = jax.random.uniform(kb, (fan_out,), jnp.float32, -bound, bound)
        params.append((w, b))
    return params


if __name__ == "__main__":
    # Small shapes consistent with the module's forward: x is [batch, input_size].
    batch = 8
    input_size = 32
    hidden_size = 32
    output_size = 16
    n_hidden_layers = 2

    key = jax.random.PRNGKey(0)
    key_x, key_p = jax.random.split(key)
    x = jax.random.normal(key_x, (batch, input_size), jnp.float32)
    params = init_fc_params(key_p, input_size, output_size, hidden_size, n_hidden_layers)

    out = fc_forward(params, x)
    out = jax.block_until_ready(out)

    # Pure-JAX reference with matching bf16 matmul inputs / f32 accumulation.
    ref = x
    for i, (w, b) in enumerate(params):
        ref = jnp.dot(ref.astype(jnp.bfloat16), w.astype(jnp.bfloat16),
                      preferred_element_type=jnp.float32) + b
        if i < len(params) - 1:
            ref = jnp.maximum(ref, 0.0)

    assert out.shape == (batch, output_size)
    max_err = float(jnp.max(jnp.abs(out - ref)))
    assert jnp.allclose(out, ref, atol=2e-2, rtol=2e-2), f"max abs err = {max_err}"
    print("KERNEL_OK")
</pallas_src>

<mosaic_0001>
module attributes {stable_mosaic.version = 11 : i64} {
  func.func @_fused_mlp_kernel(%arg0: i32, %arg1: i32, %arg2: memref<8x128xf32, #tpu.memory_space<vmem>>, %arg3: memref<1x128x128xbf16, #tpu.memory_space<vmem>>, %arg4: memref<1x1x128xf32, #tpu.memory_space<vmem>>, %arg5: memref<8x128xf32, #tpu.memory_space<vmem>>, %arg6: memref<8x128xf32, #tpu.memory_space<vmem>>) attributes {dimension_semantics = [#tpu.dimension_semantics<parallel>, #tpu.dimension_semantics<arbitrary>], iteration_bounds = array<i64: 1, 4>, scalar_prefetch = 0 : i64, scratch_operands = 1 : i64, tpu.core_type = #tpu.core_type<tc>, window_params = [{transform_indices = @transform_0, window_bounds = array<i64: 8, 128>}, {transform_indices = @transform_1, window_bounds = array<i64: 1, 128, 128>}, {transform_indices = @transform_2, window_bounds = array<i64: 1, 1, 128>}, {transform_indices = @transform_3, window_bounds = array<i64: 8, 128>}]} {
    %c0_i32 = arith.constant 0 : i32
    %0 = arith.cmpi eq, %arg1, %c0_i32 : i32
    %1 = arith.extui %0 : i1 to i32
    %c0_i32_0 = arith.constant 0 : i32
    %2 = arith.cmpi ne, %1, %c0_i32_0 : i32
    scf.if %2 {
      %c0_11 = arith.constant 0 : index
      %c0_12 = arith.constant 0 : index
      %18 = vector.load %arg2[%c0_11, %c0_12] : memref<8x128xf32, #tpu.memory_space<vmem>>, vector<8x128xf32>
      %c0_13 = arith.constant 0 : index
      %c0_14 = arith.constant 0 : index
      %19 = vector.load %arg6[%c0_13, %c0_14] : memref<8x128xf32, #tpu.memory_space<vmem>>, vector<8x128xf32>
      tpu.vector_store %arg6[%c0_13, %c0_14], %18 {strides = array<i32>} : memref<8x128xf32, #tpu.memory_space<vmem>>, vector<8x128xf32>,
    } else {
    }
    %c0 = arith.constant 0 : index
    %c0_1 = arith.constant 0 : index
    %c0_2 = arith.constant 0 : index
    %3 = vector.load %arg3[%c0, %c0_1, %c0_2] : memref<1x128x128xbf16, #tpu.memory_space<vmem>>, vector<1x128x128xbf16>
    %4 = vector.shape_cast %3 : vector<1x128x128xbf16> to vector<128x128xbf16>
    %c0_3 = arith.constant 0 : index
    %c0_4 = arith.constant 0 : index
    %5 = vector.load %arg6[%c0_3, %c0_4] : memref<8x128xf32, #tpu.memory_space<vmem>>, vector<8x128xf32>
    %6 = arith.truncf %5 : vector<8x128xf32> to vector<8x128xbf16>
    %cst = arith.constant dense<0.000000e+00> : vector<8x128xf32>
    %7 = tpu.matmul %6, %4, %cst {dimension_numbers = #tpu.dot_dimension_numbers<[1], [0], [0], [1], [0, 0, 1, 1], [], []>} : vector<8x128xbf16>, vector<128x128xbf16>, vector<8x128xf32> -> vector<8x128xf32>
    %c0_5 = arith.constant 0 : index
    %c0_6 = arith.constant 0 : index
    %c0_7 = arith.constant 0 : index
    %8 = vector.load %arg4[%c0_5, %c0_6, %c0_7] : memref<1x1x128xf32, #tpu.memory_space<vmem>>, vector<1x1x128xf32>
    %9 = vector.shape_cast %8 : vector<1x1x128xf32> to vector<1x128xf32>
    %10 = vector.broadcast %9 : vector<1x128xf32> to vector<8x128xf32>
    %11 = arith.addf %7, %10 : vector<8x128xf32>
    %c3_i32 = arith.constant 3 : i32
    %12 = arith.cmpi slt, %arg1, %c3_i32 : i32
    %13 = arith.extui %12 : i1 to i32
    %c0_i32_8 = arith.constant 0 : i32
    %14 = arith.cmpi ne, %13, %c0_i32_8 : i32
    scf.if %14 {
      %cst_11 = arith.constant 0.000000e+00 : f32
      %18 = vector.broadcast %cst_11 : f32 to vector<8x128xf32>
      %19 = arith.maximumf %11, %18 : vector<8x128xf32>
      %c0_12 = arith.constant 0 : index
      %c0_13 = arith.constant 0 : index
      %20 = vector.load %arg6[%c0_12, %c0_13] : memref<8x128xf32, #tpu.memory_space<vmem>>, vector<8x128xf32>
      tpu.vector_store %arg6[%c0_12, %c0_13], %19 {strides = array<i32>} : memref<8x128xf32, #tpu.memory_space<vmem>>, vector<8x128xf32>,
    } else {
    }
    %c3_i32_9 = arith.constant 3 : i32
    %15 = arith.cmpi eq, %arg1, %c3_i32_9 : i32
    %16 = arith.extui %15 : i1 to i32
    %c0_i32_10 = arith.constant 0 : i32
    %17 = arith.cmpi ne, %16, %c0_i32_10 : i32
    scf.if %17 {
      %c0_11 = arith.constant 0 : index
      %c0_12 = arith.constant 0 : index
      %18 = vector.load %arg5[%c0_11, %c0_12] : memref<8x128xf32, #tpu.memory_space<vmem>>, vector<8x128xf32>
      tpu.vector_store %arg5[%c0_11, %c0_12], %11 {strides = array<i32>} : memref<8x128xf32, #tpu.memory_space<vmem>>, vector<8x128xf32>,
    } else {
    }
    return
  }
  func.func @transform_0(%arg0: i32, %arg1: i32) -> (i32, i32) {
    %c0_i32 = arith.constant 0 : i32
    %c0_i32_0 = arith.constant 0 : i32
    return %arg0, %c0_i32 : i32, i32
  }
  func.func @transform_1(%arg0: i32, %arg1: i32) -> (i32, i32, i32) {
    %c0_i32 = arith.constant 0 : i32
    %c0_i32_0 = arith.constant 0 : i32
    %c0_i32_1 = arith.constant 0 : i32
    return %arg1, %c0_i32, %c0_i32_0 : i32, i32, i32
  }
  func.func @transform_2(%arg0: i32, %arg1: i32) -> (i32, i32, i32) {
    %c0_i32 = arith.constant 0 : i32
    %c0_i32_0 = arith.constant 0 : i32
    %c0_i32_1 = arith.constant 0 : i32
    return %arg1, %c0_i32, %c0_i32_0 : i32, i32, i32
  }
  func.func @transform_3(%arg0: i32, %arg1: i32) -> (i32, i32) {
    %c0_i32 = arith.constant 0 : i32
    %c0_i32_0 = arith.constant 0 : i32
    return %arg0, %c0_i32 : i32, i32
  }
}

</mosaic_0001>

<bundles_post_ra>
// kernel: tpu_custom_call.1
= control target key start
LH: loop header
LB: loop body
LE: loop exit
PB: predicated region body
PF: predicated region fallthrough
CT: control target
= control target key end

     0   :  { %8 = vsyncpa [#allocation4], 0  ;;  %s978_s0 = inlined_call_operand.hbm [shape: f32[8,128], index: 0, kind: input, shape index: {}]   ;;  %s979_s1 = inlined_call_operand.hbm [shape: bf16[4,128,128], index: 1, kind: input, shape index: {}]   ;;  %s980_s2 = inlined_call_operand.hbm [shape: f32[4,1,128], index: 2, kind: input, shape index: {}]   ;;  %s981_s3 = inlined_call_operand.hbm [shape: f32[8,128], index: 3, kind: output, shape index: {}]  }
   0x1   :  { %9 = vsyncpa [#allocation7], 0 }
   0x2   :  { %11 = vsyncpa [#allocation7 + $0x1], 0 }
   0x3   :  { %12 = vsyncpa [#allocation5], 0  ;;  %s818_s12 = smov 0   ;;  %s820_s13 = smov 0  }
   0x4   :  { %s822_s14 = smov 0   ;;  %s824_s15 = smov 0  }
   0x5   :  { %s826_s16 = smov 0   ;;  %s828_s17 = smov 0  }
   0x6 LB: > { %s27_s18 = sadd.s32 1, %s784_s16  ;;  %s63_s19 = sadd.s32 1, %s776_s14  ;;  %s788_s17 = sphi %s828_s17, %s18_s17   ;;  %s784_s16 = sphi %s826_s16, %s998_s16   ;;  %s780_s15 = sphi %s824_s15, %s997_s15   ;;  %s776_s14 = sphi %s822_s14, %s996_s14   ;;  %s772_s13 = sphi %s820_s13, %s995_s13   ;;  %s768_s12 = sphi %s818_s12, %s994_s12  }
   0x7   : > { %p28_p0 = scmp.ge.s32.totalorder %s27_s18, 4  ;;  %p70_p1 = scmp.ne.s32.totalorder %s776_s14, %s772_s13 }
   0x8   : > { %p71_p2 = scmp.eq.s32.totalorder %s788_s17, 0  ;;  %p558_p4 = scmp.lt.s32.totalorder %s788_s17, 4 }
   0x9   : > { %s1000_s18 = smov (%p28_p0, %s27_s18), 0  ;;  %s165_s21 = sand.u32 1, %s788_s17  }
   0xa   : > { %p72_p3 = por %p71_p2, %p70_p1  ;;  %s60_s20 = ssub.s32 %s784_s16, %s1000_s18 }
   0xb   : > { %p61_p5 = scmp.eq.s32.totalorder %s60_s20, 0  ;;  %s167_s22 = sand.u32 1, %s776_s14  }
   0xc   : > { %s504_s23 = sshll.u32 %s784_s16, 10  ;;  %s481_s25 = sshll.u32 %s167_s22, 6 }
   0xd   : > { %s862_s24 = scalar_select %p61_p5, %s776_s14, %s63_s19  }
   0xe   : > { %s175_s28 = scalar_lea.hbm %s979_s1, %s504_s23  ;;  %p869_p6 = pnand %p558_p4, %p72_p3 }
   0xf   : > { %s169_s30 = scalar_lea.vmem [#allocation6], %s481_s25  ;;  %s873_s5 = scalar_lea.sflag [#allocation7], %s165_s21 }
  0x10   : > { %s176_s4 = sshll.u32 %s169_s30, 4  ;;  %p982_p7 = pneg %p869_p6  ;;  %s177_s4 = int_to_ptr.vmem [resolvable:$true] %s176_s4 }
  0x11   : > { %s637_s6 = scalar_lea.vmem %s177_s4, 1024  ;;  %s790_s7 = smov [#allocation6]  }
  0x12   : > { %p638_p8 = scmp.ne.s32.totalorder %s177_s4, %s637_s6  ;;  %s642_s8 = sshll.u32 %s790_s7, 4  ;;  %s643_s8 = int_to_ptr.vmem [resolvable:$false] %s642_s8 }
  0x13   : > { %s644_s9 = scalar_lea.vmem %s643_s8, 2048  ;;  %p645_p11 = scmp.lt.s32.totalorder %s177_s4, %s643_s8 }
  0x14   : > { %p640_p9 = pnand %p638_p8, %p982_p7  ;;  %p646_p12 = scmp.lt.s32.totalorder %s644_s9, %s637_s6 }
  0x16   : > { %p641_p10 = pneg %p640_p9  ;;  %p647_p13 = por %p646_p12, %p645_p11 }
  0x18   : > { %p648_p0 = pnand %p647_p13, %p641_p10 }
  0x1a   : > { %651 = shalt.err (!%p648_p0)
}
  0x1b   : > { %s791_s10 = smov 64   ;;  %s792_s11 = smov 4  }
  0x1c   : > { %553 = dma.hbm_to_vmem [thread:$0]  (!%p869_p6), %s175_s28, 1024, %s177_s4, %s873_s5, %s791_s10, %s791_s10, %s792_s11  }
  0x1d   : > { %s884_s19 = sadd.s32 4294967295, %s788_s17   ;;  %p76_p1 = scmp.ne.s32.totalorder %s772_s13, %s768_s12 }
  0x1e   : > { %p983_p2 = scmp.eq.s32.totalorder %s884_s19, 0  ;;  %p478_p3 = scmp.ge.s32.totalorder %s788_s17, 1 }
  0x1f   : > { %p139_p4 = scmp.lt.s32.totalorder %s788_s17, 5  ;;  %s793_s23 = smov [#allocation3]  }
  0x20   : > { %p893_p5 = por %p983_p2, %p76_p1  ;;  %s154_s25 = sshll.u32 %s793_s23, 4  ;;  %s155_s25 = int_to_ptr.vmem [resolvable:$true] %s154_s25 }
  0x21   : > { %p897_p8 = pnand %p478_p3, %p139_p4  ;;  %s484_s26 = sshll.u32 %s784_s16, 4 }
  0x22   : > { %s987_s20 = scalar_select %p893_p5, 1, 0 }
  0x23   : > { %s988_s21 = scalar_select %p897_p8, 1, 0 }
  0x24   : > { %p546_p9 = pneg %p897_p8  ;;  %s189_s12 = scalar_lea.vmem [#allocation8], %s167_s22 }
  0x25   : > { %s196_s27 = sshll.u32 %s189_s12, 4  ;;  %s194_s4 = scalar_lea.hbm %s980_s2, %s484_s26  ;;  %s197_s27 = int_to_ptr.vmem [resolvable:$true] %s196_s27 }
  0x26   : > { %p547_p10 = pnand %p546_p9, %p983_p2  ;;  %s663_s6 = scalar_lea.vmem %s155_s25, 128 }
  0x27   : > { %p664_p12 = scmp.ne.s32.totalorder %s155_s25, %s663_s6  ;;  %p671_p1 = scmp.lt.s32.totalorder %s155_s25, %s155_s25 }
  0x28   : > { %p654_p11 = pneg %p547_p10  ;;  %p672_p3 = scmp.lt.s32.totalorder %s663_s6, %s663_s6 }
  0x2a   : > { %p666_p13 = pnand %p664_p12, %p654_p11  ;;  %p673_p4 = por %p672_p3, %p671_p1 }
  0x2c   : > { %p667_p0 = pneg %p666_p13 }
  0x2e   : > { %p674_p7 = pnand %p673_p4, %p667_p0 }
  0x30   : > { %677 = shalt.err (!%p674_p7)
}
  0x31   : > { %549 = dma.hbm_to_vmem [thread:$0]  (!%p547_p10), %s978_s0, 128, %s155_s25, [#allocation4]  }
  0x32   : > { %s691_s8 = scalar_lea.vmem %s197_s27, 16  ;;  %p989_p2 = pneg %p869_p6 }
  0x33   : > { %p692_p9 = scmp.ne.s32.totalorder %s197_s27, %s691_s8  ;;  %s794_s9 = smov [#allocation8]  }
  0x34   : > { %s696_s10 = sshll.u32 %s794_s9, 4  ;;  %s697_s10 = int_to_ptr.vmem [resolvable:$false] %s696_s10 }
  0x35   : > { %p694_p5 = pnand %p692_p9, %p989_p2  ;;  %s698_s11 = scalar_lea.vmem %s697_s10, 32 }
  0x36   : > { %p699_p11 = scmp.lt.s32.totalorder %s197_s27, %s697_s10  ;;  %p700_p12 = scmp.lt.s32.totalorder %s698_s11, %s691_s8 }
  0x37   : > { %p695_p8 = pneg %p694_p5 }
  0x38   : > { %p701_p13 = por %p700_p12, %p699_p11 }
  0x3a   : > { %p702_p0 = pnand %p701_p13, %p695_p8 }
  0x3c   : > { %705 = shalt.err (!%p702_p0)
}
  0x3d   : > { %556 = dma.hbm_to_vmem [thread:$0]  (!%p869_p6), %s194_s4, 16, %s197_s27, %s873_s5  }
  0x3e   : > { %p990_p7 = scmp.ne.s32.totalorder %s988_s21, 0 }
  0x3f   : > { %p991_p10 = scmp.eq.s32.totalorder (!%p990_p7), %s884_s19, 0 }
  0x40   : > { %205 = sbr.rel (%p990_p7) target bundleno = 342 (0x156), region = 32 }
  0x45   : > { %755 = dma.done.wait (%p991_p10), [#allocation4], 128   ;;  %p992_p2 = pmov %p991_p10 }
  0x46   : > { %s211_s23 = sand.u32 1, %s884_s19   ;;  %s213_s25 = sand.u32 1, %s772_s13  }
  0x47   : > { %757 = vsyncadd (%p992_p2), [#allocation4], 4294967168  ;;  %s487_s26 = sshll.u32 %s213_s25, 6  ;;  %s212_s12 = scalar_lea.sflag [#allocation7], %s211_s23 }
  0x48   : > { %s928_s28 = scalar_lea.vmem [#allocation6], %s487_s26  ;;  %p993_p5 = scmp.ne.s32.totalorder %s987_s20, 0 }
  0x4a   : > { %759 = dma.done.wait (%p993_p5), %s212_s12, 1040  }
  0x4b   : > { %761 = vsyncadd (%p993_p5), %s212_s12, 4294966256  ;;  %s934_s29 = scalar_lea.vmem [#allocation8], %s213_s25  ;;  %p488_p6 = scmp.ne.s32.totalorder %s780_s15, 0 }
  0x4d   : > { %249 = sbr.rel (%p488_p6) target bundleno = 84 (0x54), region = 48 }
  0x52   : > { %v250_v0 = vld [vmem:[#allocation3] sm:$0xff] }
  0x53   : > { %251 = vst [vmem:[#allocation2] sm:$0xff] %v250_v0 }
  0x54 PF: > { %v616_v1 = vld [vmem:[%s928_s28 + $0x38] sm:$0xff]   ;;  %v795_v2 = vmov 0.0   ;;  %v617_v3 = vld [vmem:[%s928_s28 + $0x30] sm:$0xff]   ;;  %vm796_vm0 = vmmov 0   ;;  %v618_v4 = vld [vmem:[%s928_s28 + $0x28] sm:$0xff]   ;;  %p498_p8 = scmp.ge.s32.totalorder %s780_s15, 3 }
  0x55   : > { %514 = vmatprep.subr.bf16.mxu0 %v795_v2  ;;  %530 = vmatprep.mubr.msk.bf16.mxu0 %vm796_vm0, %v795_v2  ;;  %v619_v5 = vld [vmem:[%s928_s28 + $0x20] sm:$0xff]   ;;  %v620_v6 = vld [vmem:[%s928_s28 + $0x18] sm:$0xff]   ;;  %v621_v7 = vld [vmem:[%s928_s28 + $0x10] sm:$0xff]  }
  0x56   : > { %515 = vmatpush3.bf16.msra.mxu0 %v616_v1  ;;  %v622_v8 = vld [vmem:[%s928_s28 + $0x8] sm:$0xff]   ;;  %v623_v9 = vld [vmem:[%s928_s28] sm:$0xff]   ;;  %v489_v12 = vld [vmem:[%s934_s29] ss:$0 sm:$0xff] }
  0x57   : > { %516 = vmatprep.subr.bf16.mxu0 %v795_v2 }
  0x5a   : > { %517 = vmatpush3.bf16.msra.mxu0 %v617_v3  ;;  %v268_v10 = vld [vmem:[#allocation2] sm:$0xff] }
  0x5b   : > { %518 = vmatprep.subr.bf16.mxu0 %v795_v2  ;;  %v269_v11 = vpack.c.bf16 %v268_v10, %v268_v10 }
  0x5e   : > { %519 = vmatpush3.bf16.msra.mxu0 %v618_v4 }
  0x5f   : > { %520 = vmatprep.subr.bf16.mxu0 %v795_v2 }
  0x62   : > { %521 = vmatpush3.bf16.msra.mxu0 %v619_v5 }
  0x63   : > { %522 = vmatprep.subr.bf16.mxu0 %v795_v2 }
  0x66   : > { %523 = vmatpush3.bf16.msra.mxu0 %v620_v6 }
  0x67   : > { %524 = vmatprep.subr.bf16.mxu0 %v795_v2 }
  0x6a   : > { %525 = vmatpush3.bf16.msra.mxu0 %v621_v7 }
  0x6b   : > { %526 = vmatprep.subr.bf16.mxu0 %v795_v2 }
  0x6e   : > { %527 = vmatpush3.bf16.msra.mxu0 %v622_v8 }
  0x6f   : > { %528 = vmatprep.subr.bf16.mxu0 %v795_v2 }
  0x72   : > { %529 = vmatpush3.bf16.msra.mxu0 %v623_v9 }
  0x75   : > { %531 = vmatmul.mubr.bf16.vlgmr.msra.gmra.mxu0 %v269_v11 }
 0x135   : > { %v359_v13 = vpop.f32.mrf.mxu0 }
 0x136   : > { %v360_v14 = vadd.f32 %v489_v12, %v359_v13 }
 0x137   : > { %v532_v15 = vpop.f32.mrf.mxu0  ;;  %368 = sbr.rel (%p498_p8) target bundleno = 319 (0x13f), region = 52 }
 0x139   : > { %v362_v16 = vpop.f32.mrf.mxu0 }
 0x13b   : > { %v533_v17 = vpop.f32.mrf.mxu0 }
 0x13c   : > { %v369_v18 = vmax.f32 %v360_v14, 0.0 }
 0x13e   : > { %370 = vst [vmem:[#allocation2] sm:$0xff] %v369_v18 }
 0x13f PF: > { %p499_p1 = scmp.ne.s32.totalorder %s780_s15, 3 }
 0x141   : > { %374 = sbr.rel (%p499_p1) target bundleno = 327 (0x147), region = 56 }
 0x146   : > { %375 = vst [vmem:[#allocation9] sm:$0xff] %v360_v14 }
 0x147 PF: > { %p560_p3 = scmp.eq.s32.totalorder %s884_s19, 3  ;;  %s797_s5 = smov [#allocation9]  }
 0x148   : > { %s385_s20 = sshll.u32 %s797_s5, 4  ;;  %s386_s20 = int_to_ptr.vmem [resolvable:$true] %s385_s20 }
 0x149   : > { %s706_s21 = scalar_lea.vmem %s386_s20, 128  ;;  %p713_p12 = scmp.lt.s32.totalorder %s386_s20, %s386_s20 }
 0x14a   : > { %p707_p4 = scmp.ne.s32.totalorder %s386_s20, %s706_s21  ;;  %p714_p13 = scmp.lt.s32.totalorder %s706_s21, %s706_s21 }
 0x14c   : > { %p708_p9 = pnand %p707_p4, %p560_p3  ;;  %p715_p0 = por %p714_p13, %p713_p12 }
 0x14e   : > { %p709_p11 = pneg %p708_p9 }
 0x150   : > { %p716_p7 = pnand %p715_p0, %p709_p11 }
 0x152   : > { %719 = shalt.err (!%p716_p7)
}
 0x153   : > { %543 = dma.vmem_to_hbm [thread:$0]  (%p560_p3), %s386_s20, 128, %s981_s3, [#allocation5]  }
 0x154   : > { %763 = dma.done.wait (%p560_p3), [#allocation5], 128  }
 0x155   : > { %765 = vsyncadd (%p560_p3), [#allocation5], 4294967168 }
 0x156 PF: > { %s18_s17 = sadd.s32 1, %s788_s17   ;;  %s994_s12 = smov %s772_s13 }
 0x157   : > { %p15_p10 = scmp.ge.s32.totalorder %s18_s17, 6   ;;  %s995_s13 = smov %s776_s14 }
 0x158   : > { %s996_s14 = smov %s862_s24  ;;  %s997_s15 = smov %s784_s16 }
 0x159   : > { %s998_s16 = smov %s1000_s18  ;;  %17 = sbr.rel (!%p15_p10) target bundleno = 6 (0x6), region = 99 }
 0x15e   :  { %398 = vsyncpa [#allocation4], 1 }
 0x15f   :  { %400 = vsyncpa [#allocation4 + $0x1], 1 }
 0x160   :  { %401 = vsyncpa [#allocation7], 1 }
 0x161   :  { %403 = vsyncpa [#allocation7 + $0x1], 1 }
 0x162   :  { %404 = vsyncpa [#allocation5], 1 }
 0x163   :  { %406 = vsyncpa [#allocation5 + $0x1], 1 }

</bundles_post_ra>
